<compile_context>
chip_gen: v5e
topology: v5e:2x2
jax: 0.10.0
libtpu: 0.0.40
codegen_flags: <defaults>
</compile_context>

<pallas_src>
import functools

import jax
import jax.numpy as jnp
from jax.experimental import pallas as pl
from jax.experimental.pallas import tpu as pltpu

BN_EPS = 1e-5
_VMEM_LIMIT = 32 * 1024 * 1024  # explicit scoped-VMEM budget, safe on v5e/v6e/v7x


def _round_up(x, m):
    return (x + m - 1) // m * m


# ---------------------------------------------------------------------------
# Kernel 1: fused 1x1 + 3x3 conv (single K=9*C contraction) + one-pass BN stats.
# ---------------------------------------------------------------------------
def _conv_stats_kernel(xp_ref, w_ref, mask_ref, s31_ref, sum_ref, ssq_ref,
                       *, w_img, lb):
    # xp_ref  : (Cp, L0P)   halo tile, reflect-padded rows flattened into lanes
    # w_ref   : (2F, 9*Cp)  fused weights: rows [0:F)=3x3 conv, rows [F:2F)=1x1 conv
    # mask_ref: (1, LB)     1.0 on valid lanes, 0.0 on the 2 junk columns per row
    # s31_ref : (2F, LB)    fused conv outputs for this tile
    # sum_ref : (2F, 1)     per-image running sum   (accumulated over row tiles)
    # ssq_ref : (2F, 1)     per-image running sumsq
    i = pl.program_id(1)

    z = xp_ref[...]                                    # (Cp, L0P)
    wp2 = w_img + 2
    offsets = [dy * wp2 + dx for dy in range(3) for dx in range(3)]
    taps = [z[:, o:o + lb] for o in offsets]           # 9 x (Cp, LB) lane-shifted views
    zcat = jnp.concatenate(taps, axis=0)               # (9*Cp, LB) in-register "im2col"

    r = jnp.dot(w_ref[...], zcat,
                preferred_element_type=jnp.float32)    # (2F, LB) single MXU push
    s31_ref[...] = r

    m = mask_ref[...]
    rm = r * m
    psum = jnp.sum(rm, axis=1, keepdims=True)          # (2F, 1)
    psq = jnp.sum(rm * r, axis=1, keepdims=True)       # (2F, 1)

    @pl.when(i == 0)
    def _init():
        sum_ref[...] = jnp.zeros_like(sum_ref)
        ssq_ref[...] = jnp.zeros_like(ssq_ref)

    sum_ref[...] += psum
    ssq_ref[...] += psq


# ---------------------------------------------------------------------------
# Kernel 2: fused BN1/BN2 apply + add + ReLU, plus one-pass stats of y.
# ---------------------------------------------------------------------------
def _apply_stats_kernel(s31_ref, a_ref, c_ref, mask_ref, y_ref, sum_ref, ssq_ref,
                        *, f):
    # s31_ref: (2F, LB); a_ref: (2F, 1) = [alpha_bn2 ; alpha_bn1]; c_ref: (F, 1) = c1+c2
    i = pl.program_id(1)
    t = s31_ref[...] * a_ref[...]
    y = jnp.maximum(t[:f, :] + t[f:, :] + c_ref[...], 0.0)   # (F, LB)
    y_ref[...] = y

    ym = y * mask_ref[...]
    psum = jnp.sum(ym, axis=1, keepdims=True)
    psq = jnp.sum(ym * y, axis=1, keepdims=True)

    @pl.when(i == 0)
    def _init():
        sum_ref[...] = jnp.zeros_like(sum_ref)
        ssq_ref[...] = jnp.zeros_like(ssq_ref)

    sum_ref[...] += psum
    ssq_ref[...] += psq


# ---------------------------------------------------------------------------
# Kernel 3: final BN3 as a per-channel affine (only for the last block).
# ---------------------------------------------------------------------------
def _affine_kernel(y_ref, a_ref, c_ref, o_ref):
    o_ref[...] = y_ref[...] * a_ref[...] + c_ref[...]


# ---------------------------------------------------------------------------
# pallas_call wrappers
# ---------------------------------------------------------------------------
def _conv_stats_call(xp_tiles, wcat, mask, *, w_img, lb):
    n, n_tiles, cp, l0p = xp_tiles.shape
    f2 = wcat.shape[0]
    kern = functools.partial(_conv_stats_kernel, w_img=w_img, lb=lb)
    out_shape = (
        jax.ShapeDtypeStruct((n, n_tiles, f2, lb), jnp.float32),
        jax.ShapeDtypeStruct((n, f2, 1), jnp.float32),
        jax.ShapeDtypeStruct((n, f2, 1), jnp.float32),
    )
    in_specs = [
        pl.BlockSpec((None, None, cp, l0p), lambda ni, ti: (ni, ti, 0, 0)),
        pl.BlockSpec(wcat.shape, lambda ni, ti: (0, 0)),
        pl.BlockSpec(mask.shape, lambda ni, ti: (0, 0)),
    ]
    out_specs = (
        pl.BlockSpec((None, None, f2, lb), lambda ni, ti: (ni, ti, 0, 0)),
        pl.BlockSpec((None, f2, 1), lambda ni, ti: (ni, 0, 0)),
        pl.BlockSpec((None, f2, 1), lambda ni, ti: (ni, 0, 0)),
    )
    return pl.pallas_call(
        kern,
        grid=(n, n_tiles),
        in_specs=in_specs,
        out_specs=out_specs,
        out_shape=out_shape,
        compiler_params=pltpu.CompilerParams(
            dimension_semantics=("parallel", "arbitrary"),
            vmem_limit_bytes=_VMEM_LIMIT),
    )(xp_tiles, wcat, mask)


def _apply_call(s31, acat, csum, mask):
    n, n_tiles, f2, lb = s31.shape
    f = f2 // 2
    kern = functools.partial(_apply_stats_kernel, f=f)
    out_shape = (
        jax.ShapeDtypeStruct((n, n_tiles, f, lb), jnp.float32),
        jax.ShapeDtypeStruct((n, f, 1), jnp.float32),
        jax.ShapeDtypeStruct((n, f, 1), jnp.float32),
    )
    in_specs = [
        pl.BlockSpec((None, None, f2, lb), lambda ni, ti: (ni, ti, 0, 0)),
        pl.BlockSpec((f2, 1), lambda ni, ti: (0, 0)),
        pl.BlockSpec((f, 1), lambda ni, ti: (0, 0)),
        pl.BlockSpec((1, lb), lambda ni, ti: (0, 0)),
    ]
    out_specs = (
        pl.BlockSpec((None, None, f, lb), lambda ni, ti: (ni, ti, 0, 0)),
        pl.BlockSpec((None, f, 1), lambda ni, ti: (ni, 0, 0)),
        pl.BlockSpec((None, f, 1), lambda ni, ti: (ni, 0, 0)),
    )
    return pl.pallas_call(
        kern,
        grid=(n, n_tiles),
        in_specs=in_specs,
        out_specs=out_specs,
        out_shape=out_shape,
        compiler_params=pltpu.CompilerParams(
            dimension_semantics=("parallel", "arbitrary"),
            vmem_limit_bytes=_VMEM_LIMIT),
    )(s31, acat, csum, mask)


def _affine_call(y, a, c):
    n, n_tiles, f, lb = y.shape
    return pl.pallas_call(
        _affine_kernel,
        grid=(n, n_tiles),
        in_specs=[
            pl.BlockSpec((None, None, f, lb), lambda ni, ti: (ni, ti, 0, 0)),
            pl.BlockSpec((f, 1), lambda ni, ti: (0, 0)),
            pl.BlockSpec((f, 1), lambda ni, ti: (0, 0)),
        ],
        out_specs=pl.BlockSpec((None, None, f, lb), lambda ni, ti: (ni, ti, 0, 0)),
        out_shape=jax.ShapeDtypeStruct((n, n_tiles, f, lb), jnp.float32),
        compiler_params=pltpu.CompilerParams(
            dimension_semantics=("parallel", "parallel"),
            vmem_limit_bytes=_VMEM_LIMIT),
    )(y, a, c)


# ---------------------------------------------------------------------------
# JAX glue (layout plumbing only; all hot math is inside the kernels above)
# ---------------------------------------------------------------------------
def _make_tiles(x_nchw, tile_h):
    """Reflect-pad (N,C,H,W) and cut row-halo tiles, flat spatial in lanes."""
    n, cb, h, w = x_nchw.shape
    xp = jnp.pad(x_nchw, ((0, 0), (0, 0), (1, 1), (1, 1)), mode="reflect")
    xf = xp.reshape(n, cb, (h + 2) * (w + 2))
    xf = jnp.pad(xf, ((0, 0), (0, 0), (0, 2)))              # 2 lanes of slack for last tap
    n_tiles = h // tile_h
    lb = tile_h * (w + 2)
    l0p = (tile_h + 2) * (w + 2) + 2
    tiles = jnp.stack([xf[:, :, i * lb:i * lb + l0p] for i in range(n_tiles)], axis=1)
    return tiles                                            # (N, nT, Cb, L0P)


def _untile(y, n, f, h, w, tile_h):
    """(N, nT, F, tile_h*(W+2)) -> (N, F, H, W), dropping the 2 junk columns/row."""
    n_tiles = h // tile_h
    y5 = y.reshape(n, n_tiles, f, tile_h, w + 2)[..., :w]
    return jnp.transpose(y5, (0, 2, 1, 3, 4)).reshape(n, f, h, w)


def _build_wcat(w3, w1, in_scale, cp):
    """Fuse 3x3 + 1x1 weights into a single (2F, 9*Cp) matrix.

    in_scale folds the previous block's BatchNorm scale into the weights (its shift
    becomes a per-output-channel constant which the following BatchNorm removes)."""
    f, cin = w1.shape
    w3s = w3 * in_scale[None, :, None, None]
    w1s = w1 * in_scale[None, :]
    pad_c = cp - cin
    w3p = jnp.pad(w3s, ((0, 0), (0, pad_c), (0, 0), (0, 0)))
    w1p = jnp.pad(w1s, ((0, 0), (0, pad_c)))
    w3mat = jnp.transpose(w3p, (0, 2, 3, 1)).reshape(f, 9 * cp)   # col = (dy*3+dx)*Cp + c
    w1ext = jnp.zeros((f, 9 * cp), jnp.float32).at[:, 4 * cp:5 * cp].set(w1p)
    return jnp.concatenate([w3mat, w1ext], axis=0)                # (2F, 9*Cp)


def _bn_coeffs(sum_vec, sq_vec, gamma, beta, count):
    mean = sum_vec / count
    var = jnp.maximum(sq_vec / count - mean * mean, 0.0)
    alpha = gamma * jax.lax.rsqrt(var + BN_EPS)
    shift = beta - mean * alpha
    return alpha, shift


@functools.partial(jax.jit, static_argnames=("tile_h",))
def respath_forward(x, params, *, tile_h=8):
    """ResPath forward. x: (N, Cin, H, W) float32 (NCHW) -> (N, F, H, W)."""
    n, cin0, h, w = x.shape
    assert h >= 2 and w >= 2, "reflect padding needs H, W >= 2"
    if h % tile_h != 0:
        tile_h = h
    n_tiles = h // tile_h
    lb = tile_h * (w + 2)
    f = params[0]["w1"].shape[0]
    count = float(n * h * w)

    # valid-lane mask: lanes (j mod (W+2)) >= W are junk columns of the halo layout
    col = jnp.arange(lb, dtype=jnp.int32) % (w + 2)
    mask = (col < w).astype(jnp.float32).reshape(1, lb)

    src = x                                   # block input (pre-BN values; see _build_wcat)
    in_scale = jnp.ones((cin0,), jnp.float32)
    y = None
    a3 = c3 = None
    for bi, p in enumerate(params):
        cin = src.shape[1]
        cp = _round_up(cin, 8)                # sublane-aligned channel padding (zeros)
        src_p = jnp.pad(src, ((0, 0), (0, cp - cin), (0, 0), (0, 0)))
        xp_tiles = _make_tiles(src_p, tile_h)                 # (N, nT, Cp, L0P)
        wcat = _build_wcat(p["w3"], p["w1"], in_scale, cp)    # (2F, 9*Cp)

        s31, ssum, ssq = _conv_stats_call(xp_tiles, wcat, mask, w_img=w, lb=lb)
        tot_sum = jnp.sum(ssum, axis=0)[:, 0]                 # (2F,)
        tot_sq = jnp.sum(ssq, axis=0)[:, 0]
        a2, c2 = _bn_coeffs(tot_sum[:f], tot_sq[:f], p["g2"], p["b2"], count)  # 3x3 -> BN2
        a1, c1 = _bn_coeffs(tot_sum[f:], tot_sq[f:], p["g1"], p["b1"], count)  # 1x1 -> BN1
        acat = jnp.concatenate([a2, a1]).reshape(2 * f, 1)
        csum = (c1 + c2).reshape(f, 1)

        y, ysum, ysq = _apply_call(s31, acat, csum, mask)
        a3, c3 = _bn_coeffs(jnp.sum(ysum, axis=0)[:, 0], jnp.sum(ysq, axis=0)[:, 0],
                            p["g3"], p["b3"], count)

        # BN3 of this block is folded into the NEXT block's conv weights (scale only;
        # the shift is per-channel constant and cancels inside the next BatchNorms).
        in_scale = a3
        if bi + 1 < len(params):
            src = _untile(y, n, f, h, w, tile_h)

    out_tiled = _affine_call(y, a3.reshape(f, 1), c3.reshape(f, 1))
    return _untile(out_tiled, n, f, h, w, tile_h)


# ---------------------------------------------------------------------------
# Parameter init (PyTorch layouts: conv weights OIHW / (F, Cin); BN affine per F)
# ---------------------------------------------------------------------------
def init_block_params(key, cin, f):
    ks = jax.random.split(key, 8)
    w3 = jax.random.normal(ks[0], (f, cin, 3, 3), jnp.float32) / jnp.sqrt(9.0 * cin)
    w1 = jax.random.normal(ks[1], (f, cin), jnp.float32) / jnp.sqrt(float(cin))
    g1 = 1.0 + 0.1 * jax.random.normal(ks[2], (f,), jnp.float32)
    b1 = 0.1 * jax.random.normal(ks[3], (f,), jnp.float32)
    g2 = 1.0 + 0.1 * jax.random.normal(ks[4], (f,), jnp.float32)
    b2 = 0.1 * jax.random.normal(ks[5], (f,), jnp.float32)
    g3 = 1.0 + 0.1 * jax.random.normal(ks[6], (f,), jnp.float32)
    b3 = 0.1 * jax.random.normal(ks[7], (f,), jnp.float32)
    return dict(w3=w3, w1=w1, g1=g1, b1=b1, g2=g2, b2=b2, g3=g3, b3=b3)


def init_respath_params(key, in_channels, filters, length):
    keys = jax.random.split(key, length)
    params = [init_block_params(keys[0], in_channels, filters)]
    for i in range(1, length):
        params.append(init_block_params(keys[i], filters, filters))
    return params


# ---------------------------------------------------------------------------
# Pure-JAX reference (mirrors the PyTorch module) for a tolerance check
# ---------------------------------------------------------------------------
def _bn_ref(x, g, b):
    mu = jnp.mean(x, axis=(0, 2, 3), keepdims=True)
    var = jnp.mean(jnp.square(x - mu), axis=(0, 2, 3), keepdims=True)
    return (x - mu) * jax.lax.rsqrt(var + BN_EPS) * g.reshape(1, -1, 1, 1) + b.reshape(1, -1, 1, 1)


@jax.jit
def respath_reference(x, params):
    z = x
    for p in params:
        f, cin = p["w1"].shape
        zp = jnp.pad(z, ((0, 0), (0, 0), (1, 1), (1, 1)), mode="reflect")
        s3 = jax.lax.conv_general_dilated(
            zp, p["w3"], (1, 1), "VALID",
            dimension_numbers=("NCHW", "OIHW", "NCHW"),
            precision=jax.lax.Precision.HIGHEST)
        s1 = jax.lax.conv_general_dilated(
            z, p["w1"].reshape(f, cin, 1, 1), (1, 1), "VALID",
            dimension_numbers=("NCHW", "OIHW", "NCHW"),
            precision=jax.lax.Precision.HIGHEST)
        shortcut = _bn_ref(s1, p["g1"], p["b1"])
        out = _bn_ref(s3, p["g2"], p["b2"])
        y = jnp.maximum(shortcut + out, 0.0)
        z = _bn_ref(y, p["g3"], p["b3"])
    return z


if __name__ == "__main__":
    # Small shapes, PyTorch NCHW: (N, C, H, W) = (2, 4, 16, 16), filters=8, length=3.
    N, C, H, W = 2, 4, 16, 16
    FILTERS, LENGTH = 8, 3

    key = jax.random.PRNGKey(0)
    kx, kp = jax.random.split(key)
    x = jax.random.normal(kx, (N, C, H, W), jnp.float32)
    params = init_respath_params(kp, C, FILTERS, LENGTH)

    out = respath_forward(x, params, tile_h=8)
    out = jax.block_until_ready(out)
    assert out.shape == (N, FILTERS, H, W)
    assert bool(jnp.all(jnp.isfinite(out)))

    ref = respath_reference(x, params)
    err = float(jnp.max(jnp.abs(out - ref)))
    assert err < 5e-3, f"mismatch vs reference: max|diff|={err}"

    print("KERNEL_OK")
</pallas_src>

<mosaic_0001>
module attributes {stable_mosaic.version = 11 : i64} {
  func.func @_conv_stats_kernel(%arg0: i32, %arg1: i32, %arg2: memref<1x1x8x182xf32, #tpu.memory_space<vmem>>, %arg3: memref<16x72xf32, #tpu.memory_space<vmem>>, %arg4: memref<1x144xf32, #tpu.memory_space<vmem>>, %arg5: memref<1x1x16x144xf32, #tpu.memory_space<vmem>>, %arg6: memref<1x16x1xf32, #tpu.memory_space<vmem>>, %arg7: memref<1x16x1xf32, #tpu.memory_space<vmem>>) attributes {dimension_semantics = [#tpu.dimension_semantics<parallel>, #tpu.dimension_semantics<arbitrary>], iteration_bounds = array<i64: 2, 2>, scalar_prefetch = 0 : i64, scratch_operands = 0 : i64, tpu.core_type = #tpu.core_type<tc>, window_params = [{transform_indices = @transform_0, window_bounds = array<i64: 1, 1, 8, 182>}, {pipeline_mode = #tpu.pipeline_mode<synchronous>, transform_indices = @transform_1, window_bounds = array<i64: 16, 72>}, {pipeline_mode = #tpu.pipeline_mode<synchronous>, transform_indices = @transform_2, window_bounds = array<i64: 1, 144>}, {transform_indices = @transform_3, window_bounds = array<i64: 1, 1, 16, 144>}, {transform_indices = @transform_4, window_bounds = array<i64: 1, 16, 1>}, {transform_indices = @transform_5, window_bounds = array<i64: 1, 16, 1>}]} {
    %c0 = arith.constant 0 : index
    %c0_0 = arith.constant 0 : index
    %c0_1 = arith.constant 0 : index
    %c0_2 = arith.constant 0 : index
    %0 = vector.load %arg2[%c0, %c0_0, %c0_1, %c0_2] : memref<1x1x8x182xf32, #tpu.memory_space<vmem>>, vector<1x1x8x182xf32>
    %1 = vector.shape_cast %0 : vector<1x1x8x182xf32> to vector<8x182xf32>
    %2 = vector.extract_strided_slice %1 {offsets = [0, 0], sizes = [8, 144], strides = [1, 1]} : vector<8x182xf32> to vector<8x144xf32>
    %3 = vector.extract_strided_slice %1 {offsets = [0, 1], sizes = [8, 144], strides = [1, 1]} : vector<8x182xf32> to vector<8x144xf32>
    %4 = vector.extract_strided_slice %1 {offsets = [0, 2], sizes = [8, 144], strides = [1, 1]} : vector<8x182xf32> to vector<8x144xf32>
    %5 = vector.extract_strided_slice %1 {offsets = [0, 18], sizes = [8, 144], strides = [1, 1]} : vector<8x182xf32> to vector<8x144xf32>
    %6 = vector.extract_strided_slice %1 {offsets = [0, 19], sizes = [8, 144], strides = [1, 1]} : vector<8x182xf32> to vector<8x144xf32>
    %7 = vector.extract_strided_slice %1 {offsets = [0, 20], sizes = [8, 144], strides = [1, 1]} : vector<8x182xf32> to vector<8x144xf32>
    %8 = vector.extract_strided_slice %1 {offsets = [0, 36], sizes = [8, 144], strides = [1, 1]} : vector<8x182xf32> to vector<8x144xf32>
    %9 = vector.extract_strided_slice %1 {offsets = [0, 37], sizes = [8, 144], strides = [1, 1]} : vector<8x182xf32> to vector<8x144xf32>
    %10 = vector.extract_strided_slice %1 {offsets = [0, 38], sizes = [8, 144], strides = [1, 1]} : vector<8x182xf32> to vector<8x144xf32>
    %11 = tpu.concatenate %2, %3, %4, %5, %6, %7, %8, %9, %10 in 0 : vector<8x144xf32>, vector<8x144xf32>, vector<8x144xf32>, vector<8x144xf32>, vector<8x144xf32>, vector<8x144xf32>, vector<8x144xf32>, vector<8x144xf32>, vector<8x144xf32> -> vector<72x144xf32>
    %c0_3 = arith.constant 0 : index
    %c0_4 = arith.constant 0 : index
    %12 = vector.load %arg3[%c0_3, %c0_4] : memref<16x72xf32, #tpu.memory_space<vmem>>, vector<16x72xf32>
    %cst = arith.constant dense<0.000000e+00> : vector<16x144xf32>
    %13 = tpu.matmul %12, %11, %cst {dimension_numbers = #tpu.dot_dimension_numbers<[1], [0], [0], [1], [0, 0, 1, 1], [], []>} : vector<16x72xf32>, vector<72x144xf32>, vector<16x144xf32> -> vector<16x144xf32>
    %c0_5 = arith.constant 0 : index
    %c0_6 = arith.constant 0 : index
    %c0_7 = arith.constant 0 : index
    %c0_8 = arith.constant 0 : index
    %14 = vector.load %arg5[%c0_5, %c0_6, %c0_7, %c0_8] : memref<1x1x16x144xf32, #tpu.memory_space<vmem>>, vector<1x1x16x144xf32>
    %15 = vector.shape_cast %14 : vector<1x1x16x144xf32> to vector<16x144xf32>
    %16 = vector.shape_cast %13 : vector<16x144xf32> to vector<1x1x16x144xf32>
    tpu.vector_store %arg5[%c0_5, %c0_6, %c0_7, %c0_8], %16 {strides = array<i32>} : memref<1x1x16x144xf32, #tpu.memory_space<vmem>>, vector<1x1x16x144xf32>,
    %c0_9 = arith.constant 0 : index
    %c0_10 = arith.constant 0 : index
    %17 = vector.load %arg4[%c0_9, %c0_10] : memref<1x144xf32, #tpu.memory_space<vmem>>, vector<1x144xf32>
    %18 = vector.broadcast %17 : vector<1x144xf32> to vector<16x144xf32>
    %19 = arith.mulf %13, %18 : vector<16x144xf32>
    %cst_11 = arith.constant dense<0.000000e+00> : vector<16xf32>
    %20 = vector.multi_reduction <add>, %19, %cst_11 [1] : vector<16x144xf32> to vector<16xf32>
    %21 = vector.shape_cast %20 : vector<16xf32> to vector<16x1xf32>
    %22 = arith.mulf %19, %13 : vector<16x144xf32>
    %cst_12 = arith.constant dense<0.000000e+00> : vector<16xf32>
    %23 = vector.multi_reduction <add>, %22, %cst_12 [1] : vector<16x144xf32> to vector<16xf32>
    %24 = vector.shape_cast %23 : vector<16xf32> to vector<16x1xf32>
    %c0_i32 = arith.constant 0 : i32
    %25 = arith.cmpi eq, %arg1, %c0_i32 : i32
    %26 = arith.extui %25 : i1 to i32
    %c0_i32_13 = arith.constant 0 : i32
    %27 = arith.cmpi ne, %26, %c0_i32_13 : i32
    scf.if %27 {
      %cst_26 = arith.constant 0.000000e+00 : f32
      %40 = vector.broadcast %cst_26 : f32 to vector<16x1xf32>
      %c0_27 = arith.constant 0 : index
      %c0_28 = arith.constant 0 : index
      %c0_29 = arith.constant 0 : index
      %41 = vector.load %arg6[%c0_27, %c0_28, %c0_29] : memref<1x16x1xf32, #tpu.memory_space<vmem>>, vector<1x16x1xf32>
      %42 = vector.shape_cast %41 : vector<1x16x1xf32> to vector<16x1xf32>
      %43 = vector.shape_cast %40 : vector<16x1xf32> to vector<1x16x1xf32>
      tpu.vector_store %arg6[%c0_27, %c0_28, %c0_29], %43 {strides = array<i32>} : memref<1x16x1xf32, #tpu.memory_space<vmem>>, vector<1x16x1xf32>,
      %cst_30 = arith.constant 0.000000e+00 : f32
      %44 = vector.broadcast %cst_30 : f32 to vector<16x1xf32>
      %c0_31 = arith.constant 0 : index
      %c0_32 = arith.constant 0 : index
      %c0_33 = arith.constant 0 : index
      %45 = vector.load %arg7[%c0_31, %c0_32, %c0_33] : memref<1x16x1xf32, #tpu.memory_space<vmem>>, vector<1x16x1xf32>
      %46 = vector.shape_cast %45 : vector<1x16x1xf32> to vector<16x1xf32>
      %47 = vector.shape_cast %44 : vector<16x1xf32> to vector<1x16x1xf32>
      tpu.vector_store %arg7[%c0_31, %c0_32, %c0_33], %47 {strides = array<i32>} : memref<1x16x1xf32, #tpu.memory_space<vmem>>, vector<1x16x1xf32>,
    } else {
    }
    %c0_14 = arith.constant 0 : index
    %c0_15 = arith.constant 0 : index
    %c0_16 = arith.constant 0 : index
    %28 = vector.load %arg6[%c0_14, %c0_15, %c0_16] : memref<1x16x1xf32, #tpu.memory_space<vmem>>, vector<1x16x1xf32>
    %29 = vector.shape_cast %28 : vector<1x16x1xf32> to vector<16x1xf32>
    %30 = arith.addf %29, %21 : vector<16x1xf32>
    %c0_17 = arith.constant 0 : index
    %c0_18 = arith.constant 0 : index
    %c0_19 = arith.constant 0 : index
    %31 = vector.load %arg6[%c0_17, %c0_18, %c0_19] : memref<1x16x1xf32, #tpu.memory_space<vmem>>, vector<1x16x1xf32>
    %32 = vector.shape_cast %31 : vector<1x16x1xf32> to vector<16x1xf32>
    %33 = vector.shape_cast %30 : vector<16x1xf32> to vector<1x16x1xf32>
    tpu.vector_store %arg6[%c0_17, %c0_18, %c0_19], %33 {strides = array<i32>} : memref<1x16x1xf32, #tpu.memory_space<vmem>>, vector<1x16x1xf32>,
    %c0_20 = arith.constant 0 : index
    %c0_21 = arith.constant 0 : index
    %c0_22 = arith.constant 0 : index
    %34 = vector.load %arg7[%c0_20, %c0_21, %c0_22] : memref<1x16x1xf32, #tpu.memory_space<vmem>>, vector<1x16x1xf32>
    %35 = vector.shape_cast %34 : vector<1x16x1xf32> to vector<16x1xf32>
    %36 = arith.addf %35, %24 : vector<16x1xf32>
    %c0_23 = arith.constant 0 : index
    %c0_24 = arith.constant 0 : index
    %c0_25 = arith.constant 0 : index
    %37 = vector.load %arg7[%c0_23, %c0_24, %c0_25] : memref<1x16x1xf32, #tpu.memory_space<vmem>>, vector<1x16x1xf32>
    %38 = vector.shape_cast %37 : vector<1x16x1xf32> to vector<16x1xf32>
    %39 = vector.shape_cast %36 : vector<16x1xf32> to vector<1x16x1xf32>
    tpu.vector_store %arg7[%c0_23, %c0_24, %c0_25], %39 {strides = array<i32>} : memref<1x16x1xf32, #tpu.memory_space<vmem>>, vector<1x16x1xf32>,
    return
  }
  func.func @transform_0(%arg0: i32, %arg1: i32) -> (i32, i32, i32, i32) {
    %c0_i32 = arith.constant 0 : i32
    %c0_i32_0 = arith.constant 0 : i32
    %c0_i32_1 = arith.constant 0 : i32
    return %arg0, %arg1, %c0_i32, %c0_i32_0 : i32, i32, i32, i32
  }
  func.func @transform_1(%arg0: i32, %arg1: i32) -> (i32, i32) {
    %c0_i32 = arith.constant 0 : i32
    %c0_i32_0 = arith.constant 0 : i32
    %c0_i32_1 = arith.constant 0 : i32
    return %c0_i32, %c0_i32_0 : i32, i32
  }
  func.func @transform_2(%arg0: i32, %arg1: i32) -> (i32, i32) {
    %c0_i32 = arith.constant 0 : i32
    %c0_i32_0 = arith.constant 0 : i32
    %c0_i32_1 = arith.constant 0 : i32
    return %c0_i32, %c0_i32_0 : i32, i32
  }
  func.func @transform_3(%arg0: i32, %arg1: i32) -> (i32, i32, i32, i32) {
    %c0_i32 = arith.constant 0 : i32
    %c0_i32_0 = arith.constant 0 : i32
    %c0_i32_1 = arith.constant 0 : i32
    return %arg0, %arg1, %c0_i32, %c0_i32_0 : i32, i32, i32, i32
  }
  func.func @transform_4(%arg0: i32, %arg1: i32) -> (i32, i32, i32) {
    %c0_i32 = arith.constant 0 : i32
    %c0_i32_0 = arith.constant 0 : i32
    %c0_i32_1 = arith.constant 0 : i32
    return %arg0, %c0_i32, %c0_i32_0 : i32, i32, i32
  }
  func.func @transform_5(%arg0: i32, %arg1: i32) -> (i32, i32, i32) {
    %c0_i32 = arith.constant 0 : i32
    %c0_i32_0 = arith.constant 0 : i32
    %c0_i32_1 = arith.constant 0 : i32
    return %arg0, %c0_i32, %c0_i32_0 : i32, i32, i32
  }
}

module attributes {stable_mosaic.version = 11 : i64} {
  func.func @_apply_stats_kernel(%arg0: i32, %arg1: i32, %arg2: memref<1x1x16x144xf32, #tpu.memory_space<vmem>>, %arg3: memref<16x1xf32, #tpu.memory_space<vmem>>, %arg4: memref<8x1xf32, #tpu.memory_space<vmem>>, %arg5: memref<1x144xf32, #tpu.memory_space<vmem>>, %arg6: memref<1x1x8x144xf32, #tpu.memory_space<vmem>>, %arg7: memref<1x8x1xf32, #tpu.memory_space<vmem>>, %arg8: memref<1x8x1xf32, #tpu.memory_space<vmem>>) attributes {dimension_semantics = [#tpu.dimension_semantics<parallel>, #tpu.dimension_semantics<arbitrary>], iteration_bounds = array<i64: 2, 2>, scalar_prefetch = 0 : i64, scratch_operands = 0 : i64, tpu.core_type = #tpu.core_type<tc>, window_params = [{transform_indices = @transform_0, window_bounds = array<i64: 1, 1, 16, 144>}, {pipeline_mode = #tpu.pipeline_mode<synchronous>, transform_indices = @transform_1, window_bounds = array<i64: 16, 1>}, {pipeline_mode = #tpu.pipeline_mode<synchronous>, transform_indices = @transform_2, window_bounds = array<i64: 8, 1>}, {pipeline_mode = #tpu.pipeline_mode<synchronous>, transform_indices = @transform_3, window_bounds = array<i64: 1, 144>}, {transform_indices = @transform_4, window_bounds = array<i64: 1, 1, 8, 144>}, {transform_indices = @transform_5, window_bounds = array<i64: 1, 8, 1>}, {transform_indices = @transform_6, window_bounds = array<i64: 1, 8, 1>}]} {
    %c0 = arith.constant 0 : index
    %c0_0 = arith.constant 0 : index
    %c0_1 = arith.constant 0 : index
    %c0_2 = arith.constant 0 : index
    %0 = vector.load %arg2[%c0, %c0_0, %c0_1, %c0_2] : memref<1x1x16x144xf32, #tpu.memory_space<vmem>>, vector<1x1x16x144xf32>
    %1 = vector.shape_cast %0 : vector<1x1x16x144xf32> to vector<16x144xf32>
    %c0_3 = arith.constant 0 : index
    %c0_4 = arith.constant 0 : index
    %2 = vector.load %arg3[%c0_3, %c0_4] : memref<16x1xf32, #tpu.memory_space<vmem>>, vector<16x1xf32>
    %3 = vector.broadcast %2 : vector<16x1xf32> to vector<16x144xf32>
    %4 = arith.mulf %1, %3 : vector<16x144xf32>
    %5 = vector.extract_strided_slice %4 {offsets = [0, 0], sizes = [8, 144], strides = [1, 1]} : vector<16x144xf32> to vector<8x144xf32>
    %6 = vector.extract_strided_slice %4 {offsets = [8, 0], sizes = [8, 144], strides = [1, 1]} : vector<16x144xf32> to vector<8x144xf32>
    %7 = arith.addf %5, %6 : vector<8x144xf32>
    %c0_5 = arith.constant 0 : index
    %c0_6 = arith.constant 0 : index
    %8 = vector.load %arg4[%c0_5, %c0_6] : memref<8x1xf32, #tpu.memory_space<vmem>>, vector<8x1xf32>
    %9 = vector.broadcast %8 : vector<8x1xf32> to vector<8x144xf32>
    %10 = arith.addf %7, %9 : vector<8x144xf32>
    %cst = arith.constant 0.000000e+00 : f32
    %11 = vector.broadcast %cst : f32 to vector<8x144xf32>
    %12 = arith.maximumf %10, %11 : vector<8x144xf32>
    %c0_7 = arith.constant 0 : index
    %c0_8 = arith.constant 0 : index
    %c0_9 = arith.constant 0 : index
    %c0_10 = arith.constant 0 : index
    %13 = vector.load %arg6[%c0_7, %c0_8, %c0_9, %c0_10] : memref<1x1x8x144xf32, #tpu.memory_space<vmem>>, vector<1x1x8x144xf32>
    %14 = vector.shape_cast %13 : vector<1x1x8x144xf32> to vector<8x144xf32>
    %15 = vector.shape_cast %12 : vector<8x144xf32> to vector<1x1x8x144xf32>
    tpu.vector_store %arg6[%c0_7, %c0_8, %c0_9, %c0_10], %15 {strides = array<i32>} : memref<1x1x8x144xf32, #tpu.memory_space<vmem>>, vector<1x1x8x144xf32>,
    %c0_11 = arith.constant 0 : index
    %c0_12 = arith.constant 0 : index
    %16 = vector.load %arg5[%c0_11, %c0_12] : memref<1x144xf32, #tpu.memory_space<vmem>>, vector<1x144xf32>
    %17 = vector.broadcast %16 : vector<1x144xf32> to vector<8x144xf32>
    %18 = arith.mulf %12, %17 : vector<8x144xf32>
    %cst_13 = arith.constant dense<0.000000e+00> : vector<8xf32>
    %19 = vector.multi_reduction <add>, %18, %cst_13 [1] : vector<8x144xf32> to vector<8xf32>
    %20 = vector.shape_cast %19 : vector<8xf32> to vector<8x1xf32>
    %21 = arith.mulf %18, %12 : vector<8x144xf32>
    %cst_14 = arith.constant dense<0.000000e+00> : vector<8xf32>
    %22 = vector.multi_reduction <add>, %21, %cst_14 [1] : vector<8x144xf32> to vector<8xf32>
    %23 = vector.shape_cast %22 : vector<8xf32> to vector<8x1xf32>
    %c0_i32 = arith.constant 0 : i32
    %24 = arith.cmpi eq, %arg1, %c0_i32 : i32
    %25 = arith.extui %24 : i1 to i32
    %c0_i32_15 = arith.constant 0 : i32
    %26 = arith.cmpi ne, %25, %c0_i32_15 : i32
    scf.if %26 {
      %cst_28 = arith.constant 0.000000e+00 : f32
      %39 = vector.broadcast %cst_28 : f32 to vector<8x1xf32>
      %c0_29 = arith.constant 0 : index
      %c0_30 = arith.constant 0 : index
      %c0_31 = arith.constant 0 : index
      %40 = vector.load %arg7[%c0_29, %c0_30, %c0_31] : memref<1x8x1xf32, #tpu.memory_space<vmem>>, vector<1x8x1xf32>
      %41 = vector.shape_cast %40 : vector<1x8x1xf32> to vector<8x1xf32>
      %42 = vector.shape_cast %39 : vector<8x1xf32> to vector<1x8x1xf32>
      tpu.vector_store %arg7[%c0_29, %c0_30, %c0_31], %42 {strides = array<i32>} : memref<1x8x1xf32, #tpu.memory_space<vmem>>, vector<1x8x1xf32>,
      %cst_32 = arith.constant 0.000000e+00 : f32
      %43 = vector.broadcast %cst_32 : f32 to vector<8x1xf32>
      %c0_33 = arith.constant 0 : index
      %c0_34 = arith.constant 0 : index
      %c0_35 = arith.constant 0 : index
      %44 = vector.load %arg8[%c0_33, %c0_34, %c0_35] : memref<1x8x1xf32, #tpu.memory_space<vmem>>, vector<1x8x1xf32>
      %45 = vector.shape_cast %44 : vector<1x8x1xf32> to vector<8x1xf32>
      %46 = vector.shape_cast %43 : vector<8x1xf32> to vector<1x8x1xf32>
      tpu.vector_store %arg8[%c0_33, %c0_34, %c0_35], %46 {strides = array<i32>} : memref<1x8x1xf32, #tpu.memory_space<vmem>>, vector<1x8x1xf32>,
    } else {
    }
    %c0_16 = arith.constant 0 : index
    %c0_17 = arith.constant 0 : index
    %c0_18 = arith.constant 0 : index
    %27 = vector.load %arg7[%c0_16, %c0_17, %c0_18] : memref<1x8x1xf32, #tpu.memory_space<vmem>>, vector<1x8x1xf32>
    %28 = vector.shape_cast %27 : vector<1x8x1xf32> to vector<8x1xf32>
    %29 = arith.addf %28, %20 : vector<8x1xf32>
    %c0_19 = arith.constant 0 : index
    %c0_20 = arith.constant 0 : index
    %c0_21 = arith.constant 0 : index
    %30 = vector.load %arg7[%c0_19, %c0_20, %c0_21] : memref<1x8x1xf32, #tpu.memory_space<vmem>>, vector<1x8x1xf32>
    %31 = vector.shape_cast %30 : vector<1x8x1xf32> to vector<8x1xf32>
    %32 = vector.shape_cast %29 : vector<8x1xf32> to vector<1x8x1xf32>
    tpu.vector_store %arg7[%c0_19, %c0_20, %c0_21], %32 {strides = array<i32>} : memref<1x8x1xf32, #tpu.memory_space<vmem>>, vector<1x8x1xf32>,
    %c0_22 = arith.constant 0 : index
    %c0_23 = arith.constant 0 : index
    %c0_24 = arith.constant 0 : index
    %33 = vector.load %arg8[%c0_22, %c0_23, %c0_24] : memref<1x8x1xf32, #tpu.memory_space<vmem>>, vector<1x8x1xf32>
    %34 = vector.shape_cast %33 : vector<1x8x1xf32> to vector<8x1xf32>
    %35 = arith.addf %34, %23 : vector<8x1xf32>
    %c0_25 = arith.constant 0 : index
    %c0_26 = arith.constant 0 : index
    %c0_27 = arith.constant 0 : index
    %36 = vector.load %arg8[%c0_25, %c0_26, %c0_27] : memref<1x8x1xf32, #tpu.memory_space<vmem>>, vector<1x8x1xf32>
    %37 = vector.shape_cast %36 : vector<1x8x1xf32> to vector<8x1xf32>
    %38 = vector.shape_cast %35 : vector<8x1xf32> to vector<1x8x1xf32>
    tpu.vector_store %arg8[%c0_25, %c0_26, %c0_27], %38 {strides = array<i32>} : memref<1x8x1xf32, #tpu.memory_space<vmem>>, vector<1x8x1xf32>,
    return
  }
  func.func @transform_0(%arg0: i32, %arg1: i32) -> (i32, i32, i32, i32) {
    %c0_i32 = arith.constant 0 : i32
    %c0_i32_0 = arith.constant 0 : i32
    %c0_i32_1 = arith.constant 0 : i32
    return %arg0, %arg1, %c0_i32, %c0_i32_0 : i32, i32, i32, i32
  }
  func.func @transform_1(%arg0: i32, %arg1: i32) -> (i32, i32) {
    %c0_i32 = arith.constant 0 : i32
    %c0_i32_0 = arith.constant 0 : i32
    %c0_i32_1 = arith.constant 0 : i32
    return %c0_i32, %c0_i32_0 : i32, i32
  }
  func.func @transform_2(%arg0: i32, %arg1: i32) -> (i32, i32) {
    %c0_i32 = arith.constant 0 : i32
    %c0_i32_0 = arith.constant 0 : i32
    %c0_i32_1 = arith.constant 0 : i32
    return %c0_i32, %c0_i32_0 : i32, i32
  }
  func.func @transform_3(%arg0: i32, %arg1: i32) -> (i32, i32) {
    %c0_i32 = arith.constant 0 : i32
    %c0_i32_0 = arith.constant 0 : i32
    %c0_i32_1 = arith.constant 0 : i32
    return %c0_i32, %c0_i32_0 : i32, i32
  }
  func.func @transform_4(%arg0: i32, %arg1: i32) -> (i32, i32, i32, i32) {
    %c0_i32 = arith.constant 0 : i32
    %c0_i32_0 = arith.constant 0 : i32
    %c0_i32_1 = arith.constant 0 : i32
    return %arg0, %arg1, %c0_i32, %c0_i32_0 : i32, i32, i32, i32
  }
  func.func @transform_5(%arg0: i32, %arg1: i32) -> (i32, i32, i32) {
    %c0_i32 = arith.constant 0 : i32
    %c0_i32_0 = arith.constant 0 : i32
    %c0_i32_1 = arith.constant 0 : i32
    return %arg0, %c0_i32, %c0_i32_0 : i32, i32, i32
  }
  func.func @transform_6(%arg0: i32, %arg1: i32) -> (i32, i32, i32) {
    %c0_i32 = arith.constant 0 : i32
    %c0_i32_0 = arith.constant 0 : i32
    %c0_i32_1 = arith.constant 0 : i32
    return %arg0, %c0_i32, %c0_i32_0 : i32, i32, i32
  }
}

module attributes {stable_mosaic.version = 11 : i64} {
  func.func @_affine_kernel(%arg0: i32, %arg1: i32, %arg2: memref<1x1x8x144xf32, #tpu.memory_space<vmem>>, %arg3: memref<8x1xf32, #tpu.memory_space<vmem>>, %arg4: memref<8x1xf32, #tpu.memory_space<vmem>>, %arg5: memref<1x1x8x144xf32, #tpu.memory_space<vmem>>) attributes {dimension_semantics = [#tpu.dimension_semantics<parallel>, #tpu.dimension_semantics<parallel>], iteration_bounds = array<i64: 2, 2>, scalar_prefetch = 0 : i64, scratch_operands = 0 : i64, tpu.core_type = #tpu.core_type<tc>, window_params = [{transform_indices = @transform_0, window_bounds = array<i64: 1, 1, 8, 144>}, {pipeline_mode = #tpu.pipeline_mode<synchronous>, transform_indices = @transform_1, window_bounds = array<i64: 8, 1>}, {pipeline_mode = #tpu.pipeline_mode<synchronous>, transform_indices = @transform_2, window_bounds = array<i64: 8, 1>}, {transform_indices = @transform_3, window_bounds = array<i64: 1, 1, 8, 144>}]} {
    %c0 = arith.constant 0 : index
    %c0_0 = arith.constant 0 : index
    %c0_1 = arith.constant 0 : index
    %c0_2 = arith.constant 0 : index
    %0 = vector.load %arg2[%c0, %c0_0, %c0_1, %c0_2] : memref<1x1x8x144xf32, #tpu.memory_space<vmem>>, vector<1x1x8x144xf32>
    %1 = vector.shape_cast %0 : vector<1x1x8x144xf32> to vector<8x144xf32>
    %c0_3 = arith.constant 0 : index
    %c0_4 = arith.constant 0 : index
    %2 = vector.load %arg3[%c0_3, %c0_4] : memref<8x1xf32, #tpu.memory_space<vmem>>, vector<8x1xf32>
    %3 = vector.broadcast %2 : vector<8x1xf32> to vector<8x144xf32>
    %4 = arith.mulf %1, %3 : vector<8x144xf32>
    %c0_5 = arith.constant 0 : index
    %c0_6 = arith.constant 0 : index
    %5 = vector.load %arg4[%c0_5, %c0_6] : memref<8x1xf32, #tpu.memory_space<vmem>>, vector<8x1xf32>
    %6 = vector.broadcast %5 : vector<8x1xf32> to vector<8x144xf32>
    %7 = arith.addf %4, %6 : vector<8x144xf32>
    %c0_7 = arith.constant 0 : index
    %c0_8 = arith.constant 0 : index
    %c0_9 = arith.constant 0 : index
    %c0_10 = arith.constant 0 : index
    %8 = vector.load %arg5[%c0_7, %c0_8, %c0_9, %c0_10] : memref<1x1x8x144xf32, #tpu.memory_space<vmem>>, vector<1x1x8x144xf32>
    %9 = vector.shape_cast %8 : vector<1x1x8x144xf32> to vector<8x144xf32>
    %10 = vector.shape_cast %7 : vector<8x144xf32> to vector<1x1x8x144xf32>
    tpu.vector_store %arg5[%c0_7, %c0_8, %c0_9, %c0_10], %10 {strides = array<i32>} : memref<1x1x8x144xf32, #tpu.memory_space<vmem>>, vector<1x1x8x144xf32>,
    return
  }
  func.func @transform_0(%arg0: i32, %arg1: i32) -> (i32, i32, i32, i32) {
    %c0_i32 = arith.constant 0 : i32
    %c0_i32_0 = arith.constant 0 : i32
    %c0_i32_1 = arith.constant 0 : i32
    return %arg0, %arg1, %c0_i32, %c0_i32_0 : i32, i32, i32, i32
  }
  func.func @transform_1(%arg0: i32, %arg1: i32) -> (i32, i32) {
    %c0_i32 = arith.constant 0 : i32
    %c0_i32_0 = arith.constant 0 : i32
    %c0_i32_1 = arith.constant 0 : i32
    return %c0_i32, %c0_i32_0 : i32, i32
  }
  func.func @transform_2(%arg0: i32, %arg1: i32) -> (i32, i32) {
    %c0_i32 = arith.constant 0 : i32
    %c0_i32_0 = arith.constant 0 : i32
    %c0_i32_1 = arith.constant 0 : i32
    return %c0_i32, %c0_i32_0 : i32, i32
  }
  func.func @transform_3(%arg0: i32, %arg1: i32) -> (i32, i32, i32, i32) {
    %c0_i32 = arith.constant 0 : i32
    %c0_i32_0 = arith.constant 0 : i32
    %c0_i32_1 = arith.constant 0 : i32
    return %arg0, %arg1, %c0_i32, %c0_i32_0 : i32, i32, i32, i32
  }
}

</mosaic_0001>

<bundles_post_ra>
// kernel: respath_forward.7
= control target key start
LH: loop header
LB: loop body
LE: loop exit
PB: predicated region body
PF: predicated region fallthrough
CT: control target
= control target key end

     0   :  { %s837_s18 = smov 0   ;;  %s839_s19 = smov 0   ;;  %s943_s0 = inlined_call_operand.vmem [shape: f32[2,2,8,182], index: 0, kind: input, shape index: {}]   ;;  %s944_s1 = inlined_call_operand.vmem [shape: f32[16,72], index: 1, kind: input, shape index: {}]   ;;  %s945_s2 = inlined_call_operand.vmem [shape: f32[1,144], index: 2, kind: input, shape index: {}]   ;;  %s946_s3 = inlined_call_operand.vmem [shape: f32[2,2,16,144], index: 3, kind: output, shape index: {0}]   ;;  %s947_s4 = inlined_call_operand.vmem [shape: f32[2,16,1], index: 4, kind: output, shape index: {1}]   ;;  %s948_s5 = inlined_call_operand.vmem [shape: f32[2,16,1], index: 5, kind: output, shape index: {2}]  }
   0x1   :  { %s841_s20 = smov 0   ;;  %s843_s21 = smov 0  }
   0x2   :  { %s845_s22 = smov 0  }
   0x3 LB: > { %s25_s23 = sadd.s32 1, %s788_s20  ;;  %s28_s24 = sadd.s32 1, %s792_s21  ;;  %s796_s22 = sphi %s845_s22, %s16_s22   ;;  %s792_s21 = sphi %s843_s21, %s952_s21   ;;  %s788_s20 = sphi %s841_s20, %s951_s20   ;;  %s784_s19 = sphi %s839_s19, %s950_s19   ;;  %s780_s18 = sphi %s837_s18, %s949_s18  }
   0x4   : > { %p26_p0 = scmp.ge.s32.totalorder %s25_s23, 2  ;;  %p631_p1 = scmp.ge.s32.totalorder %s796_s22, 1 }
   0x5   : > { %p212_p2 = scmp.lt.s32.totalorder %s796_s22, 5 }
   0x6   : > { %s954_s23 = smov (%p26_p0, %s25_s23), 0  ;;  %s956_s24 = smov (!%p26_p0, %s28_s24), %s792_s21 }
   0x7   : > { %p213_p3 = pnand %p631_p1, %p212_p2  ;;  %p30_p4 = scmp.ge.s32.totalorder %s956_s24, 2 }
   0x8   : > { %p258_p5 = scmp.lt.s32.totalorder (!%p213_p3), %s784_s19, 1  ;;  %p260_p6 = scmp.lt.s32.totalorder (!%p213_p3), %s780_s18, 1 }
   0x9   : > { %s958_s24 = smov (%p30_p4, %s956_s24), 0  ;;  %216 = sbr.rel (%p213_p3) target bundleno = 435 (0x1b3), region = 32 }
   0xa   : > { %s798_s15 = smov (!%p213_p3), 90   ;;  %s799_s16 = smov (!%p213_p3), 92  }
   0xb   : > { %s800_s17 = smov (!%p213_p3), 109   ;;  %s804_s8 = smov (!%p213_p3), 126  }
   0xc   : > { %s805_s9 = smov (!%p213_p3), 127   ;;  %p646_p7 = scmp.ne.s32.totalorder (!%p213_p3), %s780_s18, 0 }
   0xe   : > { %s960_s19 = smov (!%p258_p5, %s784_s19), 1  ;;  %vm350_vm0 = vcmask 736256   ;;  %vm342_vm1 = vcmask 744448   ;;  %vm334_vm2 = vcmask 752640   ;;  %vm326_vm3 = vcmask 883712   ;;  %v354_v35 = vld [vmem:[%s944_s1] sm:$0xff] }
   0xf   : > { %s261_s25 = scalar_select %p260_p6, %s780_s18, 1  ;;  %vm318_vm4 = vcmask 891904   ;;  %vm310_vm5 = vcmask 900096   ;;  %vm302_vm6 = vcmask 1031168   ;;  %vm294_vm7 = vcmask 1039360   ;;  %v355_v36 = vld [vmem:[%s944_s1 + $0x8] sm:$0xff] }
  0x10   : > { %s633_s26 = sshll.u32 %s960_s19, 2  ;;  %s649_s27 = sshll.u32 %s960_s19, 4  ;;  %vm356_vm8 = vcmask 588800   ;;  %v414_v37 = vld [vmem:[%s945_s2] sm:$0x3]  ;;  %vm410_vm9 = vcmask 130048  }
  0x11   : > { %s632_s28 = sshll.u32 %s261_s25, 1  ;;  %s874_s6 = scalar_lea.vmem %s947_s4, %s649_s27  ;;  %v417_v38 = vperm.slane %v414_v37, 1  ;;  %v416_v39 = vperm.slane %v414_v37, 0 }
  0x12   : > { %s264_s7 = sadd.s32 %s633_s26, %s632_s28  ;;  %s879_s10 = scalar_lea.vmem %s948_s5, %s649_s27 }
  0x13   : > { %s634_s11 = sshll.u32 %s264_s7, 3  ;;  %s801_s26 = smov 91  }
  0x14   : > { %s266_s14 = scalar_lea.vmem %s943_s0, %s634_s11  ;;  %s802_s27 = smov 108  }
  0x15   : > { %v884_v0 = vld [vmem:[%s266_s14] sm:$0xff]  ;;  %v886_v1 = vld [vmem:[%s266_s14 + $0x8] sm:$0xff]  ;;  %s803_s28 = smov 110   ;;  %s635_s29 = sshll.u32 %s261_s25, 2 }
  0x16   : > { %v718_v2 = vpack.i.bf16 %v886_v1, %v884_v0  ;;  %s636_s30 = sshll.u32 %s960_s19, 3 }
  0x17   : > { %s890_s7 = sadd.s32 %s636_s30, %s635_s29 }
  0x18   : > { %719 = vrot.lane.b32.xlu0 %v718_v2, %s798_s15  ;;  %729 = vrot.lane.b32.xlu1 %v718_v2, %s799_s16  ;;  %s637_s15 = sshll.u32 %s890_s7, 3 }
  0x19   : > { %739 = vrot.lane.b32.xlu2 %v718_v2, %s800_s17 }
  0x20   : > { %724 = vrot.lane.b32.xlu0 %v718_v2, %s801_s26  ;;  %734 = vrot.lane.b32.xlu1 %v718_v2, %s802_s27  ;;  %s275_s26 = scalar_lea.vmem %s946_s3, %s637_s15 }
  0x21   : > { %744 = vrot.lane.b32.xlu2 %v718_v2, %s803_s28 }
  0x28   : > { %749 = vrot.lane.b32.xlu0 %v718_v2, %s804_s8  ;;  %754 = vrot.lane.b32.xlu1 %v718_v2, %s805_s9 }
  0x73   : > { %v740_v3 = vpop.permute.xlu2 %739 }
  0x74   : > { %v742_v19 = vunpack.i.h.bf16 %v740_v3  ;;  %v741_v20 = vunpack.i.l.bf16 %v740_v3 }
  0x76   : > { %v319_v26 = vsel %vm318_vm4, %v741_v20, %v742_v19 }
  0x7b   : > { %v745_v17 = vpop.permute.xlu2 %744 }
  0x7c   : > { %v747_v21 = vunpack.i.h.bf16 %v745_v17  ;;  %v746_v22 = vunpack.i.l.bf16 %v745_v17 }
  0x7e   : > { %v311_v28 = vsel %vm310_vm5, %v746_v22, %v747_v21 }
  0x8a   : > { %v720_v4 = vpop.permute.xlu0 %719  ;;  %v730_v5 = vpop.permute.xlu1 %729 }
  0x8b   : > { %v722_v6 = vunpack.i.h.bf16 %v720_v4  ;;  %v721_v7 = vunpack.i.l.bf16 %v720_v4  ;;  %v732_v9 = vunpack.i.h.bf16 %v730_v5  ;;  %v731_v10 = vunpack.i.l.bf16 %v730_v5 }
  0x8d   : > { %393 = vmatpush.msra.mxu1 %v722_v6  ;;  %660 = vmatpush.msra.mxu3 %v722_v6  ;;  %v351_v8 = vsel %vm350_vm0, %v721_v7, %v722_v6  ;;  %v335_v23 = vsel %vm334_vm2, %v731_v10, %v732_v9 }
  0x8e   : > { %370 = vmatpush.msra.mxu0 %v351_v8  ;;  %651 = vmatpush.msra.mxu2 %v351_v8 }
  0x92   : > { %v725_v11 = vpop.permute.xlu0 %724  ;;  %v735_v12 = vpop.permute.xlu1 %734 }
  0x93   : > { %v727_v13 = vunpack.i.h.bf16 %v725_v11  ;;  %v726_v14 = vunpack.i.l.bf16 %v725_v11  ;;  %v737_v15 = vunpack.i.h.bf16 %v735_v12  ;;  %v736_v16 = vunpack.i.l.bf16 %v735_v12 }
  0x95   : > { %394 = vmatpush.msra.mxu1 %v727_v13  ;;  %661 = vmatpush.msra.mxu3 %v727_v13  ;;  %v343_v18 = vsel %vm342_vm1, %v726_v14, %v727_v13  ;;  %v327_v24 = vsel %vm326_vm3, %v736_v16, %v737_v15 }
  0x96   : > { %371 = vmatpush.msra.mxu0 %v343_v18  ;;  %652 = vmatpush.msra.mxu2 %v343_v18 }
  0x97   : > { %395 = vmatpush.msra.mxu1 %v732_v9  ;;  %662 = vmatpush.msra.mxu3 %v732_v9 }
  0x98   : > { %372 = vmatpush.msra.mxu0 %v335_v23  ;;  %653 = vmatpush.msra.mxu2 %v335_v23 }
  0x99   : > { %396 = vmatpush.msra.mxu1 %v737_v15  ;;  %663 = vmatpush.msra.mxu3 %v737_v15 }
  0x9a   : > { %373 = vmatpush.msra.mxu0 %v327_v24  ;;  %654 = vmatpush.msra.mxu2 %v327_v24  ;;  %v750_v25 = vpop.permute.xlu0 %749  ;;  %v755_v27 = vpop.permute.xlu1 %754 }
  0x9b   : > { %397 = vmatpush.msra.mxu1 %v742_v19  ;;  %664 = vmatpush.msra.mxu3 %v742_v19  ;;  %v752_v29 = vunpack.i.h.bf16 %v750_v25  ;;  %v751_v30 = vunpack.i.l.bf16 %v750_v25  ;;  %v757_v31 = vunpack.i.h.bf16 %v755_v27  ;;  %v756_v32 = vunpack.i.l.bf16 %v755_v27 }
  0x9c   : > { %374 = vmatpush.msra.mxu0 %v319_v26  ;;  %655 = vmatpush.msra.mxu2 %v319_v26 }
  0x9d   : > { %398 = vmatpush.msra.mxu1 %v747_v21  ;;  %665 = vmatpush.msra.mxu3 %v747_v21  ;;  %v303_v33 = vsel %vm302_vm6, %v751_v30, %v752_v29  ;;  %v295_v34 = vsel %vm294_vm7, %v756_v32, %v757_v31 }
  0x9e   : > { %375 = vmatpush.msra.mxu0 %v311_v28  ;;  %656 = vmatpush.msra.mxu2 %v311_v28 }
  0x9f   : > { %399 = vmatpush.msra.mxu1 %v752_v29  ;;  %666 = vmatpush.msra.mxu3 %v752_v29 }
  0xa0   : > { %376 = vmatpush.msra.mxu0 %v303_v33  ;;  %657 = vmatpush.msra.mxu2 %v303_v33 }
  0xa1   : > { %400 = vmatpush.msra.mxu1 %v757_v31  ;;  %667 = vmatpush.msra.mxu3 %v757_v31 }
  0xa2   : > { %377 = vmatpush.msra.mxu0 %v295_v34  ;;  %658 = vmatpush.msra.mxu2 %v295_v34 }
  0xa3   : > { %401 = vmatpush.msra.mxu1 %v886_v1  ;;  %668 = vmatpush.msra.mxu3 %v886_v1 }
  0xa4   : > { %378 = vmatpush.msra.mxu0 %v884_v0  ;;  %659 = vmatpush.msra.mxu2 %v884_v0 }
  0xa5   : > { %644 = vmatmul.msk.f32.vlgmr.msra.gmra.mxu1 %vm356_vm8, %v354_v35  ;;  %645 = vmatmul.msk.f32.vlgmr.msra.gmra.mxu3 %vm356_vm8, %v355_v36 }
  0xa6   : > { %642 = vmatmul.msk.f32.vlgmr.msra.gmra.mxu0 %vm356_vm8, %v354_v35  ;;  %643 = vmatmul.msk.f32.vlgmr.msra.gmra.mxu2 %vm356_vm8, %v355_v36 }
 0x122   : > { %v403_v40 = vpop.f32.mrf.mxu1 }
 0x123   : > { %411 = vst.msk [vmem:[%s275_s26 + $0x8] sm:$0xff] %vm410_vm9, %v403_v40  ;;  %v421_v41 = vmul.f32 %v417_v38, %v403_v40  ;;  %v380_v42 = vpop.f32.mrf.mxu0 }
 0x124   : > { %409 = vst [vmem:[%s275_s26] sm:$0xff] %v380_v42  ;;  %v420_v43 = vmul.f32 %v416_v39, %v380_v42 }
 0x125   : > { %v433_v44 = vmul.f32 %v421_v41, %v403_v40  ;;  %v424_v45 = vsel %vm410_vm9, %v421_v41, 0.0 }
 0x126   : > { %v432_v46 = vmul.f32 %v420_v43, %v380_v42  ;;  %v425_v47 = vadd.f32 %v424_v45, %v420_v43 }
 0x127   : > { %v436_v48 = vsel %vm410_vm9, %v433_v44, 0.0 }
 0x128   : > { %v406_v49 = vpop.f32.mrf.mxu3  ;;  %426 = vadd.xlane.f32.xlu2 %v425_v47  ;;  %v437_v50 = vadd.f32 %v436_v48, %v432_v46 }
 0x129   : > { %413 = vst.msk [vmem:[%s275_s26 + $0x18] sm:$0xff] %vm410_vm9, %v406_v49  ;;  %v423_v51 = vmul.f32 %v417_v38, %v406_v49  ;;  %v383_v52 = vpop.f32.mrf.mxu2 }
 0x12a   : > { %412 = vst [vmem:[%s275_s26 + $0x10] sm:$0xff] %v383_v52  ;;  %v422_v53 = vmul.f32 %v416_v39, %v383_v52  ;;  %438 = vadd.xlane.f32.xlu1 %v437_v50 }
 0x12b   : > { %v435_v54 = vmul.f32 %v423_v51, %v406_v49  ;;  %v428_v55 = vsel %vm410_vm9, %v423_v51, 0.0 }
 0x12c   : > { %v434_v56 = vmul.f32 %v422_v53, %v383_v52  ;;  %v429_v57 = vadd.f32 %v428_v55, %v422_v53 }
 0x12d   : > { %v440_v58 = vsel %vm410_vm9, %v435_v54, 0.0 }
 0x12e   : > { %430 = vadd.xlane.f32.xlu0 %v429_v57  ;;  %v441_v59 = vadd.f32 %v440_v58, %v434_v56 }
 0x130   : > { %442 = vadd.xlane.f32.xlu2 %v441_v59 }
 0x19b   : > { %v427_v60 = vpop.xlane.xlu2 %426 }
 0x19d   : > { %v439_v61 = vpop.xlane.xlu1 %438 }
 0x19f   : > { %447 = sbr.rel (%p646_p7) target bundleno = 425 (0x1a9), region = 36 }
 0x1a1   : > { %v431_v62 = vpop.xlane.xlu0 %430 }
 0x1a3   : > { %v443_v63 = vpop.xlane.xlu2 %442 }
 0x1a4   : > { %vm448_vm10 = vcmask 7168   ;;  %v806_v0 = vmov 0.0  }
 0x1a5   : > { %449 = vst.msk [vmem:[%s874_s6] sm:$0xff] %vm448_vm10, %v806_v0 }
 0x1a6   : > { %450 = vst.msk [vmem:[%s874_s6 + $0x8] sm:$0xff] %vm448_vm10, %v806_v0 }
 0x1a7   : > { %451 = vst.msk [vmem:[%s879_s10] sm:$0xff] %vm448_vm10, %v806_v0 }
 0x1a8   : > { %452 = vst.msk [vmem:[%s879_s10 + $0x8] sm:$0xff] %vm448_vm10, %v806_v0 }
 0x1a9 PF: > { %vm457_vm11 = vcmask 7168  }
 0x1ac   : > { %v453_v1 = vld [vmem:[%s874_s6] sm:$0xff] }
 0x1ad   : > { %v454_v2 = vld [vmem:[%s874_s6 + $0x8] sm:$0xff]  ;;  %v455_v4 = vadd.f32 %v453_v1, %v427_v60 }
 0x1ae   : > { %v460_v3 = vld [vmem:[%s879_s10] sm:$0xff]  ;;  %v456_v5 = vadd.f32 %v454_v2, %v431_v62 }
 0x1af   : > { %v462_v6 = vadd.f32 %v460_v3, %v439_v61  ;;  %v461_v7 = vld [vmem:[%s879_s10 + $0x8] sm:$0xff]  ;;  %458 = vst.msk [vmem:[%s874_s6] sm:$0xff] %vm457_vm11, %v455_v4 }
 0x1b0   : > { %v463_v8 = vadd.f32 %v461_v7, %v443_v63  ;;  %459 = vst.msk [vmem:[%s874_s6 + $0x8] sm:$0xff] %vm457_vm11, %v456_v5 }
 0x1b1   : > { %464 = vst.msk [vmem:[%s879_s10] sm:$0xff] %vm457_vm11, %v462_v6 }
 0x1b2   : > { %465 = vst.msk [vmem:[%s879_s10 + $0x8] sm:$0xff] %vm457_vm11, %v463_v8 }
 0x1b3 PF: > { %s16_s22 = sadd.s32 1, %s796_s22   ;;  %s949_s18 = smov %s788_s20 }
 0x1b4   : > { %p13_p8 = scmp.ge.s32.totalorder %s16_s22, 6   ;;  %s950_s19 = smov %s792_s21 }
 0x1b5   : > { %s951_s20 = smov %s954_s23  ;;  %s952_s21 = smov %s958_s24 }
 0x1b6   :  { %15 = sbr.rel (!%p13_p8) target bundleno = 3 (0x3), region = 90 }

// kernel: respath_forward.8
= control target key start
LH: loop header
LB: loop body
LE: loop exit
PB: predicated region body
PF: predicated region fallthrough
CT: control target
= control target key end

     0   :  { %s670_s21 = smov 0   ;;  %s672_s22 = smov 0   ;;  %s754_s0 = inlined_call_operand.vmem [shape: f32[2,2,16,144], index: 0, kind: input, shape index: {}]   ;;  %s755_s1 = inlined_call_operand.vmem [shape: f32[16,1], index: 1, kind: input, shape index: {}]   ;;  %s756_s2 = inlined_call_operand.vmem [shape: f32[8,1], index: 2, kind: input, shape index: {}]   ;;  %s757_s3 = inlined_call_operand.vmem [shape: f32[1,144], index: 3, kind: input, shape index: {}]   ;;  %s758_s4 = inlined_call_operand.vmem [shape: f32[2,2,8,144], index: 4, kind: output, shape index: {0}]   ;;  %s759_s5 = inlined_call_operand.vmem [shape: f32[2,8,1], index: 5, kind: output, shape index: {1}]   ;;  %s760_s6 = inlined_call_operand.vmem [shape: f32[2,8,1], index: 6, kind: output, shape index: {2}]  }
   0x1   :  { %s674_s23 = smov 0   ;;  %s676_s24 = smov 0  }
   0x2   :  { %s678_s25 = smov 0  }
   0x3 LB: > { %s26_s26 = sadd.s32 1, %s623_s23  ;;  %s29_s27 = sadd.s32 1, %s627_s24  ;;  %s631_s25 = sphi %s678_s25, %s17_s25   ;;  %s627_s24 = sphi %s676_s24, %s764_s24   ;;  %s623_s23 = sphi %s674_s23, %s763_s23   ;;  %s619_s22 = sphi %s672_s22, %s762_s22   ;;  %s615_s21 = sphi %s670_s21, %s761_s21  }
   0x4   : > { %p27_p0 = scmp.ge.s32.totalorder %s26_s26, 2  ;;  %p537_p1 = scmp.ge.s32.totalorder %s631_s25, 1 }
   0x5   : > { %p237_p2 = scmp.lt.s32.totalorder %s631_s25, 5 }
   0x6   : > { %s766_s26 = smov (%p27_p0, %s26_s26), 0  ;;  %s768_s27 = smov (!%p27_p0, %s29_s27), %s627_s24 }
   0x7   : > { %p238_p3 = pnand %p537_p1, %p237_p2  ;;  %p31_p4 = scmp.ge.s32.totalorder %s768_s27, 2 }
   0x8   : > { %p283_p5 = scmp.lt.s32.totalorder (!%p238_p3), %s619_s22, 1  ;;  %p285_p6 = scmp.lt.s32.totalorder (!%p238_p3), %s615_s21, 1 }
   0x9   : > { %s770_s27 = smov (%p31_p4, %s768_s27), 0  ;;  %241 = sbr.rel (%p238_p3) target bundleno = 283 (0x11b), region = 36 }
   0xa   : > { %p546_p7 = scmp.ne.s32.totalorder (!%p238_p3), %s615_s21, 0 }
   0xe   : > { %v313_v0 = vld [vmem:[%s755_s1] sm:$0xff]  ;;  %v633_v2 = vmov 0   ;;  %s772_s22 = smov (!%p283_p5, %s619_s22), 1  ;;  %v314_v3 = vld [vmem:[%s755_s1 + $0x8] sm:$0xff]  ;;  %vm342_vm0 = vcmask 130048  }
   0xf   : > { %v331_v1 = vld [vmem:[%s756_s2] sm:$0xff]  ;;  %591 = vset.pattern.permute.xlu0 %v633_v2  ;;  %592 = vset.pattern.permute.xlu1 %v633_v2  ;;  %s539_s8 = sshll.u32 %s772_s22, 3  ;;  %s542_s9 = sshll.u32 %s772_s22, 2 }
  0x10   : > { %317 = vperm.xlu0 %591, %v313_v0   ;;  %334 = vperm.xlu1 %592, %v331_v1   ;;  %s711_s11 = scalar_lea.vmem %s759_s5, %s539_s8  ;;  %s716_s14 = scalar_lea.vmem %s760_s6, %s539_s8  ;;  %v344_v15 = vld [vmem:[%s757_s3] sm:$0x3] }
  0x11   : > { %s286_s17 = scalar_select %p285_p6, %s615_s21, 1  ;;  %v346_v20 = vperm.slane %v344_v15, 0  ;;  %v347_v21 = vperm.slane %v344_v15, 1 }
  0x13   : > { %s538_s18 = sshll.u32 %s286_s17, 2  ;;  %s541_s7 = sshll.u32 %s286_s17, 1 }
  0x14   : > { %s289_s19 = sadd.s32 %s539_s8, %s538_s18  ;;  %s298_s10 = sadd.s32 %s542_s9, %s541_s7 }
  0x15   : > { %s540_s20 = sshll.u32 %s289_s19, 3  ;;  %s543_s13 = sshll.u32 %s298_s10, 3 }
  0x16   : > { %s291_s30 = scalar_lea.vmem %s754_s0, %s540_s20  ;;  %s300_s16 = scalar_lea.vmem %s758_s4, %s543_s13 }
  0x17   : > { %v309_v5 = vld [vmem:[%s291_s30] sm:$0xff]  ;;  %v310_v6 = vld [vmem:[%s291_s30 + $0x8] sm:$0xff]  ;;  %v311_v7 = vld [vmem:[%s291_s30 + $0x10] sm:$0xff] }
  0x18   : > { %322 = vperm.xlu0 %591, %v314_v3   ;;  %v312_v8 = vld [vmem:[%s291_s30 + $0x18] sm:$0xff] }
  0x82   : > { %v318_v4 = vpop.permute.xlu0 %317  ;;  %v335_v14 = vpop.permute.xlu1 %334 }
  0x83   : > { %v325_v10 = vmul.f32 %v318_v4, %v309_v5  ;;  %v326_v11 = vmul.f32 %v318_v4, %v310_v6 }
  0x8a   : > { %v323_v9 = vpop.permute.xlu0 %322 }
  0x8b   : > { %v327_v12 = vmul.f32 %v323_v9, %v311_v7  ;;  %v328_v13 = vmul.f32 %v323_v9, %v312_v8 }
  0x8d   : > { %v329_v16 = vadd.f32 %v327_v12, %v325_v10  ;;  %v330_v17 = vadd.f32 %v328_v13, %v326_v11 }
  0x8f   : > { %v337_v18 = vadd.f32 %v335_v14, %v329_v16  ;;  %v338_v19 = vadd.f32 %v335_v14, %v330_v17 }
  0x91   : > { %v339_v22 = vmax.f32 %v337_v18, 0.0  ;;  %v340_v23 = vmax.f32 %v338_v19, 0.0 }
  0x93   : > { %341 = vst [vmem:[%s300_s16] sm:$0xff] %v339_v22  ;;  %v350_v24 = vmul.f32 %v346_v20, %v339_v22  ;;  %v351_v25 = vmul.f32 %v347_v21, %v340_v23 }
  0x94   : > { %343 = vst.msk [vmem:[%s300_s16 + $0x8] sm:$0xff] %vm342_vm0, %v340_v23 }
  0x95   : > { %v352_v26 = vsel %vm342_vm0, %v351_v25, 0.0  ;;  %v356_v27 = vmul.f32 %v350_v24, %v339_v22  ;;  %v357_v28 = vmul.f32 %v351_v25, %v340_v23 }
  0x96   : > { %v353_v29 = vadd.f32 %v352_v26, %v350_v24 }
  0x97   : > { %v358_v30 = vsel %vm342_vm0, %v357_v28, 0.0 }
  0x98   : > { %354 = vadd.xlane.f32.xlu1 %v353_v29  ;;  %v359_v31 = vadd.f32 %v358_v30, %v356_v27 }
  0x9a   : > { %360 = vadd.xlane.f32.xlu2 %v359_v31 }
 0x109   : > { %365 = sbr.rel (%p546_p7) target bundleno = 273 (0x111), region = 40 }
 0x10b   : > { %v355_v32 = vpop.xlane.xlu1 %354 }
 0x10d   : > { %v361_v33 = vpop.xlane.xlu2 %360 }
 0x10e   : > { %vm366_vm1 = vcmask 7168   ;;  %v634_v34 = vmov 0.0  }
 0x10f   : > { %367 = vst.msk [vmem:[%s711_s11] sm:$0xff] %vm366_vm1, %v634_v34 }
 0x110   : > { %368 = vst.msk [vmem:[%s716_s14] sm:$0xff] %vm366_vm1, %v634_v34 }
 0x111 PF: > { %vm371_vm2 = vcmask 7168  }
 0x116   : > { %v369_v35 = vld [vmem:[%s711_s11] sm:$0xff] }
 0x117   : > { %v373_v36 = vld [vmem:[%s716_s14] sm:$0xff]  ;;  %v370_v37 = vadd.f32 %v369_v35, %v355_v32 }
 0x118   : > { %v374_v38 = vadd.f32 %v373_v36, %v361_v33 }
 0x119   : > { %372 = vst.msk [vmem:[%s711_s11] sm:$0xff] %vm371_vm2, %v370_v37 }
 0x11a   : > { %375 = vst.msk [vmem:[%s716_s14] sm:$0xff] %vm371_vm2, %v374_v38 }
 0x11b PF: > { %s17_s25 = sadd.s32 1, %s631_s25   ;;  %s761_s21 = smov %s623_s23 }
 0x11c   : > { %p14_p8 = scmp.ge.s32.totalorder %s17_s25, 6   ;;  %s762_s22 = smov %s627_s24 }
 0x11d   : > { %s763_s23 = smov %s766_s26  ;;  %s764_s24 = smov %s770_s27 }
 0x11e   :  { %16 = sbr.rel (!%p14_p8) target bundleno = 3 (0x3), region = 94 }

// kernel: respath_forward.13
= control target key start
LH: loop header
LB: loop body
LE: loop exit
PB: predicated region body
PF: predicated region fallthrough
CT: control target
= control target key end

     0   :  { %s439_s12 = smov 0   ;;  %s441_s13 = smov 0   ;;  %s496_s0 = inlined_call_operand.vmem [shape: f32[2,2,8,144], index: 0, kind: input, shape index: {}]   ;;  %s497_s1 = inlined_call_operand.vmem [shape: f32[8,1], index: 1, kind: input, shape index: {}]   ;;  %s498_s2 = inlined_call_operand.vmem [shape: f32[8,1], index: 2, kind: input, shape index: {}]   ;;  %s499_s3 = inlined_call_operand.vmem [shape: f32[2,2,8,144], index: 3, kind: output, shape index: {}]  }
   0x1   :  { %s443_s14 = smov 0   ;;  %s445_s15 = smov 0  }
   0x2   :  { %s447_s16 = smov 0  }
   0x3 LB: > { %s22_s17 = sadd.s32 1, %s408_s14  ;;  %s25_s18 = sadd.s32 1, %s412_s15  ;;  %s416_s16 = sphi %s447_s16, %s13_s16   ;;  %s412_s15 = sphi %s445_s15, %s503_s15   ;;  %s408_s14 = sphi %s443_s14, %s502_s14   ;;  %s404_s13 = sphi %s441_s13, %s501_s13   ;;  %s400_s12 = sphi %s439_s12, %s500_s12  }
   0x4   : > { %p23_p0 = scmp.ge.s32.totalorder %s22_s17, 2  ;;  %p327_p1 = scmp.ge.s32.totalorder %s416_s16, 1 }
   0x5   : > { %p157_p2 = scmp.lt.s32.totalorder %s416_s16, 5 }
   0x6   : > { %s505_s17 = smov (%p23_p0, %s22_s17), 0  ;;  %s507_s18 = smov (!%p23_p0, %s25_s18), %s412_s15 }
   0x7   : > { %p158_p3 = pnand %p327_p1, %p157_p2  ;;  %p27_p4 = scmp.ge.s32.totalorder %s507_s18, 2 }
   0x8   : > { %p189_p5 = scmp.lt.s32.totalorder (!%p158_p3), %s404_s13, 1  ;;  %p191_p6 = scmp.lt.s32.totalorder (!%p158_p3), %s400_s12, 1 }
   0x9   : > { %s509_s18 = smov (%p27_p4, %s507_s18), 0  ;;  %161 = sbr.rel (%p158_p3) target bundleno = 143 (0x8f), region = 32 }
   0xe   : > { %v209_v0 = vld [vmem:[%s497_s1] sm:$0xff]  ;;  %v418_v1 = vmov 0   ;;  %s511_s13 = smov (!%p189_p5, %s404_s13), 1  ;;  %s513_s12 = smov (!%p191_p6, %s400_s12), 1  ;;  %vm226_vm0 = vcmask 130048  }
   0xf   : > { %377 = vset.pattern.permute.xlu0 %v418_v1  ;;  %v217_v2 = vld [vmem:[%s498_s2] sm:$0xff]  ;;  %s328_s23 = sshll.u32 %s513_s12, 1  ;;  %s329_s24 = sshll.u32 %s511_s13, 2 }
  0x10   : > { %212 = vperm.xlu0 %377, %v209_v0   ;;  %s195_s25 = sadd.s32 %s329_s24, %s328_s23 }
  0x11   : > { %s330_s26 = sshll.u32 %s195_s25, 3 }
  0x12   : > { %s197_s29 = scalar_lea.vmem %s496_s0, %s330_s26  ;;  %s206_s5 = scalar_lea.vmem %s499_s3, %s330_s26 }
  0x13   : > { %v207_v4 = vld [vmem:[%s197_s29] sm:$0xff]  ;;  %v208_v5 = vld [vmem:[%s197_s29 + $0x8] sm:$0xff] }
  0x18   : > { %220 = vperm.xlu0 %377, %v217_v2  }
  0x82   : > { %v213_v3 = vpop.permute.xlu0 %212 }
  0x83   : > { %v215_v6 = vmul.f32 %v213_v3, %v207_v4  ;;  %v216_v7 = vmul.f32 %v213_v3, %v208_v5 }
  0x8a   : > { %v221_v8 = vpop.permute.xlu0 %220 }
  0x8b   : > { %v223_v9 = vadd.f32 %v221_v8, %v215_v6  ;;  %v224_v10 = vadd.f32 %v221_v8, %v216_v7 }
  0x8d   : > { %225 = vst [vmem:[%s206_s5] sm:$0xff] %v223_v9 }
  0x8e   : > { %227 = vst.msk [vmem:[%s206_s5 + $0x8] sm:$0xff] %vm226_vm0, %v224_v10 }
  0x8f PF: > { %s13_s16 = sadd.s32 1, %s416_s16   ;;  %s500_s12 = smov %s408_s14 }
  0x90   : > { %p10_p7 = scmp.ge.s32.totalorder %s13_s16, 6   ;;  %s501_s13 = smov %s412_s15 }
  0x91   : > { %s502_s14 = smov %s505_s17  ;;  %s503_s15 = smov %s509_s18 }
  0x92   :  { %12 = sbr.rel (!%p10_p7) target bundleno = 3 (0x3), region = 62 }

</bundles_post_ra>
